<compile_context>
chip_gen: v7x
topology: tpu7x:2x2x1
jax: 0.10.0
libtpu: 0.0.40
codegen_flags: <defaults>
</compile_context>

<pallas_src>
import functools

import jax
import jax.numpy as jnp
from jax.experimental import pallas as pl
from jax.experimental.pallas import tpu as pltpu

_NEG_INF = -1e30  # large finite negative: safe for masked tiles (no -inf - -inf)


def _round_up(x, m):
    return ((x + m - 1) // m) * m


def _pick_seq_tile(T, target):
    """Sequence tile: multiple of 8 (sublane), <= target; T is padded to it."""
    t = min(target, _round_up(T, 8))
    t = max(8, (t // 8) * 8)
    return t


def _vmem_limit_bytes():
    """Scoped-VMEM budget: physical minus headroom, capped (v7x=64MiB/core)."""
    try:
        cap = pltpu.get_tpu_info().vmem_capacity_bytes
    except Exception:
        cap = 64 * 1024 * 1024        # conservative fallback (v7x per-core)
    return int(min(max(cap - 16 * 1024 * 1024, 32 * 1024 * 1024),
                   100 * 1024 * 1024))


# --------------------------------------------------------------------------
# Kernel 1: fused QKV projection + RoPE rotation (split layout)
# --------------------------------------------------------------------------
def _qkv_rope_kernel(x_ref, w_ref, cos_ref, sin_ref, q_ref, k_ref, v_ref, *,
                     d_head):
    x = x_ref[0]                          # (ts, d)        bf16
    w = w_ref[...]                        # (d, 3*d_H)     bf16
    proj = jnp.dot(x, w, preferred_element_type=jnp.float32)   # (ts, 3*d_H)

    h = d_head // 2
    c = cos_ref[...]                      # (ts, h) f32  (per-pair cos)
    s = sin_ref[...]                      # (ts, h) f32  (per-pair sin)

    # columns: [q_even, q_odd, k_even, k_odd, v]
    qe = proj[:, 0 * h:1 * h]
    qo = proj[:, 1 * h:2 * h]
    ke = proj[:, 2 * h:3 * h]
    ko = proj[:, 3 * h:4 * h]
    v = proj[:, 4 * h:6 * h]

    # RoPE in split layout (pure elementwise VPU math, no permute needed):
    #   out[2i]   = x[2i]*cos + x[2i+1]*sin
    #   out[2i+1] = x[2i+1]*cos - x[2i]*sin
    q_ref[0] = jnp.concatenate([qe * c + qo * s, qo * c - qe * s],
                               axis=-1).astype(q_ref.dtype)
    k_ref[0] = jnp.concatenate([ke * c + ko * s, ko * c - ke * s],
                               axis=-1).astype(k_ref.dtype)
    v_ref[0] = v.astype(v_ref.dtype)


# --------------------------------------------------------------------------
# Kernel 2: causal flash attention with online softmax
# --------------------------------------------------------------------------
def _flash_attn_kernel(q_ref, k_ref, v_ref, o_ref, m_sc, l_sc, acc_sc, *,
                       tq, tk):
    qi = pl.program_id(1)
    ki = pl.program_id(2)

    @pl.when(ki == 0)
    def _init():
        m_sc[...] = jnp.full(m_sc.shape, _NEG_INF, m_sc.dtype)
        l_sc[...] = jnp.zeros(l_sc.shape, l_sc.dtype)
        acc_sc[...] = jnp.zeros(acc_sc.shape, acc_sc.dtype)

    needed = ki * tk < (qi + 1) * tq        # tile not fully above the diagonal
    on_diag = (ki + 1) * tk > qi * tq       # tile straddles the diagonal

    @pl.when(needed)
    def _compute():
        q = q_ref[0]                        # (tq, d_H) bf16 (scaled by d^-0.5)
        k = k_ref[0]                        # (tk, d_H) bf16
        v = v_ref[0]                        # (tk, d_H) bf16

        s = jax.lax.dot_general(q, k, (((1,), (1,)), ((), ())),
                                preferred_element_type=jnp.float32)  # (tq, tk)

        def _online_softmax(s):
            m_prev = m_sc[...]
            m_new = jnp.maximum(m_prev, jnp.max(s, axis=-1, keepdims=True))
            alpha = jnp.exp(m_prev - m_new)
            p = jnp.exp(s - m_new)
            l_sc[...] = alpha * l_sc[...] + jnp.sum(p, axis=-1, keepdims=True)
            acc_sc[...] = alpha * acc_sc[...] + jnp.dot(
                p.astype(v.dtype), v, preferred_element_type=jnp.float32)
            m_sc[...] = m_new

        # Only diagonal-straddling tiles pay for the mask; interior tiles
        # below the diagonal take the unmasked fast path.
        @pl.when(on_diag)
        def _masked():
            row = qi * tq + jax.lax.broadcasted_iota(jnp.int32, (tq, tk), 0)
            col = ki * tk + jax.lax.broadcasted_iota(jnp.int32, (tq, tk), 1)
            _online_softmax(jnp.where(row >= col, s, _NEG_INF))

        @pl.when(jnp.logical_not(on_diag))
        def _unmasked():
            _online_softmax(s)

    @pl.when(ki == pl.num_programs(2) - 1)
    def _finalize():
        inv = pl.reciprocal(l_sc[...], approx=True)
        o_ref[0] = (acc_sc[...] * inv).astype(o_ref.dtype)


# --------------------------------------------------------------------------
# Wrapper
# --------------------------------------------------------------------------
def rope_attention_head(x, wq, wk, wv, *, seq_tile=512):
    """RoPEAttentionHead.forward.

    x: (B, T, d) float32.
    wq, wk, wv: torch nn.Linear weight layout, shape (d_H, d), no bias.
    Returns (B, T, d_H) float32.
    """
    B, T, d = x.shape
    d_H = wq.shape[0]
    assert d_H % 2 == 0
    h = d_H // 2
    scale = d ** (-0.5)

    t_seq = _pick_seq_tile(T, seq_tile)
    T_pad = _round_up(T, t_seq)

    # theta exactly as in the PyTorch module (base 10, (i-1) 1-based, /d),
    # one value per pair since the module duplicates each entry.
    theta_pair = jnp.array([10.0 ** (-2.0 * (j - 1) / d) for j in range(h)],
                           dtype=jnp.float32)                      # (h,)
    pos = jnp.arange(1, T_pad + 1, dtype=jnp.float32)[:, None]     # (T_pad, 1)
    cos_p = jnp.cos(pos * theta_pair[None, :])                     # (T_pad, h)
    sin_p = jnp.sin(pos * theta_pair[None, :])                     # (T_pad, h)

    # Split (de-interleaved) column layout; fold the d^-0.5 score scale into
    # the Q columns for free.  v keeps the original layout.
    wq_t = jnp.transpose(wq).astype(jnp.float32) * scale
    wk_t = jnp.transpose(wk).astype(jnp.float32)
    wv_t = jnp.transpose(wv).astype(jnp.float32)
    w_all = jnp.concatenate(
        [wq_t[:, 0::2], wq_t[:, 1::2], wk_t[:, 0::2], wk_t[:, 1::2], wv_t],
        axis=1)                                                    # (d, 3*d_H)

    x_in = x if T_pad == T else jnp.pad(x, ((0, 0), (0, T_pad - T), (0, 0)))
    x_bf = x_in.astype(jnp.bfloat16)
    w_bf = w_all.astype(jnp.bfloat16)

    vmem_limit = _vmem_limit_bytes()

    # ---- kernel 1: projection + RoPE ------------------------------------
    ts = t_seq
    ns = T_pad // ts
    # TODO(synk): on v7x a pipeline_mode=pl.Buffered(1) on the constant W slab
    # spec would halve its VMEM footprint (index map is constant so the second
    # buffer is waste); kept default-buffered here for portability.
    q_rot, k_rot, v = pl.pallas_call(
        functools.partial(_qkv_rope_kernel, d_head=d_H),
        out_shape=(jax.ShapeDtypeStruct((B, T_pad, d_H), jnp.bfloat16),
                   jax.ShapeDtypeStruct((B, T_pad, d_H), jnp.bfloat16),
                   jax.ShapeDtypeStruct((B, T_pad, d_H), jnp.bfloat16)),
        grid_spec=pltpu.PrefetchScalarGridSpec(
            num_scalar_prefetch=0,
            grid=(B, ns),
            in_specs=[
                pl.BlockSpec((1, ts, d), lambda b, i: (b, i, 0)),      # x
                pl.BlockSpec((d, 3 * d_H), lambda b, i: (0, 0)),       # W_all
                pl.BlockSpec((ts, h), lambda b, i: (i, 0)),            # cos
                pl.BlockSpec((ts, h), lambda b, i: (i, 0)),            # sin
            ],
            out_specs=[
                pl.BlockSpec((1, ts, d_H), lambda b, i: (b, i, 0)),
                pl.BlockSpec((1, ts, d_H), lambda b, i: (b, i, 0)),
                pl.BlockSpec((1, ts, d_H), lambda b, i: (b, i, 0)),
            ],
        ),
        compiler_params=pltpu.CompilerParams(
            dimension_semantics=("parallel", "parallel"),
            vmem_limit_bytes=vmem_limit),
    )(x_bf, w_bf, cos_p, sin_p)

    # ---- kernel 2: causal flash attention --------------------------------
    tq = tk = t_seq
    nq = nk = T_pad // t_seq

    def _q_map(b, qi, ki):
        return (b, qi, 0)

    def _kv_map(b, qi, ki):
        # Clamp so causally-skipped kv tiles map to an already-resident block
        # -> Pallas skips their DMA entirely (up to ~50% less K/V HBM read).
        kmax = ((qi + 1) * tq - 1) // tk
        return (b, jnp.minimum(ki, kmax), 0)

    out = pl.pallas_call(
        functools.partial(_flash_attn_kernel, tq=tq, tk=tk),
        out_shape=jax.ShapeDtypeStruct((B, T_pad, d_H), jnp.float32),
        grid_spec=pltpu.PrefetchScalarGridSpec(
            num_scalar_prefetch=0,
            grid=(B, nq, nk),
            in_specs=[
                pl.BlockSpec((1, tq, d_H), _q_map),    # q
                pl.BlockSpec((1, tk, d_H), _kv_map),   # k
                pl.BlockSpec((1, tk, d_H), _kv_map),   # v
            ],
            out_specs=pl.BlockSpec((1, tq, d_H), lambda b, qi, ki: (b, qi, 0)),
            scratch_shapes=[
                pltpu.VMEM((tq, 1), jnp.float32),      # running max
                pltpu.VMEM((tq, 1), jnp.float32),      # running denom
                pltpu.VMEM((tq, d_H), jnp.float32),    # output accumulator
            ],
        ),
        compiler_params=pltpu.CompilerParams(
            dimension_semantics=("parallel", "parallel", "arbitrary"),
            vmem_limit_bytes=vmem_limit),
    )(q_rot, k_rot, v)

    if T_pad != T:
        out = out[:, :T, :]
    return out


# --------------------------------------------------------------------------
# Pure-JAX reference (mirrors the PyTorch forward, incl. in-place rotation)
# --------------------------------------------------------------------------
def _rotation_ref(x, theta):
    _, T, dh = x.shape
    pos = jnp.arange(1, T + 1, dtype=jnp.float32)[:, None]
    cos = jnp.cos(pos * theta[None, :])
    sin = jnp.sin(pos * theta[None, :])
    res_cos = x * cos
    sign = jnp.where(jnp.arange(dh) % 2 == 0, -1.0, 1.0)   # negate even idx
    x_neg = x * sign
    swap = jnp.arange(dh).reshape(-1, 2)[:, ::-1].reshape(-1)
    x_sw = x_neg[..., swap]
    return res_cos + x_sw * sin


def _reference(x, wq, wk, wv):
    B, T, d = x.shape
    d_H = wq.shape[0]
    theta = jnp.array(
        [10.0 ** (-2.0 * (i - 1) / d) for i in range(d_H // 2) for _ in range(2)],
        dtype=jnp.float32)
    q = x @ wq.T
    k = x @ wk.T
    v = x @ wv.T
    q = _rotation_ref(q, theta)
    k = _rotation_ref(k, theta)
    s = (q @ jnp.swapaxes(k, -2, -1)) * d ** (-0.5)
    mask = jnp.tril(jnp.ones((T, T)))
    s = jnp.where(mask == 0, -jnp.inf, s)
    a = jax.nn.softmax(s, axis=-1)
    return a @ v


if __name__ == "__main__":
    key = jax.random.PRNGKey(0)

    # Case 1: small aligned shapes (single tile).
    B, T, d, d_H = 2, 8, 32, 8
    k0, k1, k2, k3 = jax.random.split(key, 4)
    x = jax.random.normal(k0, (B, T, d), jnp.float32)
    wq = jax.random.normal(k1, (d_H, d), jnp.float32) * 0.1   # torch (out, in)
    wk = jax.random.normal(k2, (d_H, d), jnp.float32) * 0.1
    wv = jax.random.normal(k3, (d_H, d), jnp.float32) * 0.1

    out = jax.block_until_ready(rope_attention_head(x, wq, wk, wv))
    ref = _reference(x, wq, wk, wv)
    assert out.shape == (B, T, d_H)
    err = float(jnp.max(jnp.abs(out - ref)))
    assert jnp.allclose(out, ref, atol=2e-2, rtol=2e-2), f"max abs err {err}"

    # Case 2: ragged T (exercises padding, multi-tile causal clamp,
    # masked / unmasked score paths).
    T2 = 13
    x2 = jax.random.normal(jax.random.PRNGKey(1), (B, T2, d), jnp.float32)
    out2 = jax.block_until_ready(
        rope_attention_head(x2, wq, wk, wv, seq_tile=8))
    ref2 = _reference(x2, wq, wk, wv)
    assert out2.shape == (B, T2, d_H)
    err2 = float(jnp.max(jnp.abs(out2 - ref2)))
    assert jnp.allclose(out2, ref2, atol=2e-2, rtol=2e-2), f"max abs err {err2}"

    print("KERNEL_OK")
</pallas_src>

<mosaic_0001>
module attributes {stable_mosaic.version = 11 : i64} {
  func.func @_qkv_rope_kernel(%arg0: i32, %arg1: i32, %arg2: memref<1x8x32xbf16, #tpu.memory_space<vmem>>, %arg3: memref<32x24xbf16, #tpu.memory_space<vmem>>, %arg4: memref<8x4xf32, #tpu.memory_space<vmem>>, %arg5: memref<8x4xf32, #tpu.memory_space<vmem>>, %arg6: memref<1x8x8xbf16, #tpu.memory_space<vmem>>, %arg7: memref<1x8x8xbf16, #tpu.memory_space<vmem>>, %arg8: memref<1x8x8xbf16, #tpu.memory_space<vmem>>) attributes {dimension_semantics = [#tpu.dimension_semantics<parallel>, #tpu.dimension_semantics<parallel>], iteration_bounds = array<i64: 2, 1>, scalar_prefetch = 0 : i64, scratch_operands = 0 : i64, tpu.core_type = #tpu.core_type<tc>, window_params = [{transform_indices = @transform_0, window_bounds = array<i64: 1, 8, 32>}, {pipeline_mode = #tpu.pipeline_mode<synchronous>, transform_indices = @transform_1, window_bounds = array<i64: 32, 24>}, {transform_indices = @transform_2, window_bounds = array<i64: 8, 4>}, {transform_indices = @transform_3, window_bounds = array<i64: 8, 4>}, {transform_indices = @transform_4, window_bounds = array<i64: 1, 8, 8>}, {transform_indices = @transform_5, window_bounds = array<i64: 1, 8, 8>}, {transform_indices = @transform_6, window_bounds = array<i64: 1, 8, 8>}]} {
    %c0 = arith.constant 0 : index
    %c0_0 = arith.constant 0 : index
    %c0_1 = arith.constant 0 : index
    %0 = vector.load %arg2[%c0, %c0_0, %c0_1] : memref<1x8x32xbf16, #tpu.memory_space<vmem>>, vector<1x8x32xbf16>
    %1 = vector.shape_cast %0 : vector<1x8x32xbf16> to vector<8x32xbf16>
    %c0_2 = arith.constant 0 : index
    %c0_3 = arith.constant 0 : index
    %2 = vector.load %arg3[%c0_2, %c0_3] : memref<32x24xbf16, #tpu.memory_space<vmem>>, vector<32x24xbf16>
    %cst = arith.constant dense<0.000000e+00> : vector<8x24xf32>
    %3 = tpu.matmul %1, %2, %cst {dimension_numbers = #tpu.dot_dimension_numbers<[1], [0], [0], [1], [0, 0, 1, 1], [], []>} : vector<8x32xbf16>, vector<32x24xbf16>, vector<8x24xf32> -> vector<8x24xf32>
    %c0_4 = arith.constant 0 : index
    %c0_5 = arith.constant 0 : index
    %4 = vector.load %arg4[%c0_4, %c0_5] : memref<8x4xf32, #tpu.memory_space<vmem>>, vector<8x4xf32>
    %c0_6 = arith.constant 0 : index
    %c0_7 = arith.constant 0 : index
    %5 = vector.load %arg5[%c0_6, %c0_7] : memref<8x4xf32, #tpu.memory_space<vmem>>, vector<8x4xf32>
    %6 = vector.extract_strided_slice %3 {offsets = [0, 0], sizes = [8, 4], strides = [1, 1]} : vector<8x24xf32> to vector<8x4xf32>
    %7 = vector.extract_strided_slice %3 {offsets = [0, 4], sizes = [8, 4], strides = [1, 1]} : vector<8x24xf32> to vector<8x4xf32>
    %8 = vector.extract_strided_slice %3 {offsets = [0, 8], sizes = [8, 4], strides = [1, 1]} : vector<8x24xf32> to vector<8x4xf32>
    %9 = vector.extract_strided_slice %3 {offsets = [0, 12], sizes = [8, 4], strides = [1, 1]} : vector<8x24xf32> to vector<8x4xf32>
    %10 = vector.extract_strided_slice %3 {offsets = [0, 16], sizes = [8, 8], strides = [1, 1]} : vector<8x24xf32> to vector<8x8xf32>
    %11 = arith.mulf %6, %4 : vector<8x4xf32>
    %12 = arith.mulf %7, %5 : vector<8x4xf32>
    %13 = arith.addf %11, %12 : vector<8x4xf32>
    %14 = arith.mulf %7, %4 : vector<8x4xf32>
    %15 = arith.mulf %6, %5 : vector<8x4xf32>
    %16 = arith.subf %14, %15 : vector<8x4xf32>
    %17 = tpu.concatenate %13, %16 in 1 : vector<8x4xf32>, vector<8x4xf32> -> vector<8x8xf32>
    %18 = arith.truncf %17 : vector<8x8xf32> to vector<8x8xbf16>
    %c0_8 = arith.constant 0 : index
    %c0_9 = arith.constant 0 : index
    %c0_10 = arith.constant 0 : index
    %19 = vector.load %arg6[%c0_8, %c0_9, %c0_10] : memref<1x8x8xbf16, #tpu.memory_space<vmem>>, vector<1x8x8xbf16>
    %20 = vector.shape_cast %19 : vector<1x8x8xbf16> to vector<8x8xbf16>
    %21 = vector.shape_cast %18 : vector<8x8xbf16> to vector<1x8x8xbf16>
    tpu.vector_store %arg6[%c0_8, %c0_9, %c0_10], %21 {strides = array<i32>} : memref<1x8x8xbf16, #tpu.memory_space<vmem>>, vector<1x8x8xbf16>,
    %22 = arith.mulf %8, %4 : vector<8x4xf32>
    %23 = arith.mulf %9, %5 : vector<8x4xf32>
    %24 = arith.addf %22, %23 : vector<8x4xf32>
    %25 = arith.mulf %9, %4 : vector<8x4xf32>
    %26 = arith.mulf %8, %5 : vector<8x4xf32>
    %27 = arith.subf %25, %26 : vector<8x4xf32>
    %28 = tpu.concatenate %24, %27 in 1 : vector<8x4xf32>, vector<8x4xf32> -> vector<8x8xf32>
    %29 = arith.truncf %28 : vector<8x8xf32> to vector<8x8xbf16>
    %c0_11 = arith.constant 0 : index
    %c0_12 = arith.constant 0 : index
    %c0_13 = arith.constant 0 : index
    %30 = vector.load %arg7[%c0_11, %c0_12, %c0_13] : memref<1x8x8xbf16, #tpu.memory_space<vmem>>, vector<1x8x8xbf16>
    %31 = vector.shape_cast %30 : vector<1x8x8xbf16> to vector<8x8xbf16>
    %32 = vector.shape_cast %29 : vector<8x8xbf16> to vector<1x8x8xbf16>
    tpu.vector_store %arg7[%c0_11, %c0_12, %c0_13], %32 {strides = array<i32>} : memref<1x8x8xbf16, #tpu.memory_space<vmem>>, vector<1x8x8xbf16>,
    %33 = arith.truncf %10 : vector<8x8xf32> to vector<8x8xbf16>
    %c0_14 = arith.constant 0 : index
    %c0_15 = arith.constant 0 : index
    %c0_16 = arith.constant 0 : index
    %34 = vector.load %arg8[%c0_14, %c0_15, %c0_16] : memref<1x8x8xbf16, #tpu.memory_space<vmem>>, vector<1x8x8xbf16>
    %35 = vector.shape_cast %34 : vector<1x8x8xbf16> to vector<8x8xbf16>
    %36 = vector.shape_cast %33 : vector<8x8xbf16> to vector<1x8x8xbf16>
    tpu.vector_store %arg8[%c0_14, %c0_15, %c0_16], %36 {strides = array<i32>} : memref<1x8x8xbf16, #tpu.memory_space<vmem>>, vector<1x8x8xbf16>,
    return
  }
  func.func @transform_0(%arg0: i32, %arg1: i32) -> (i32, i32, i32) {
    %c0_i32 = arith.constant 0 : i32
    %c0_i32_0 = arith.constant 0 : i32
    return %arg0, %arg1, %c0_i32 : i32, i32, i32
  }
  func.func @transform_1(%arg0: i32, %arg1: i32) -> (i32, i32) {
    %c0_i32 = arith.constant 0 : i32
    %c0_i32_0 = arith.constant 0 : i32
    %c0_i32_1 = arith.constant 0 : i32
    return %c0_i32, %c0_i32_0 : i32, i32
  }
  func.func @transform_2(%arg0: i32, %arg1: i32) -> (i32, i32) {
    %c0_i32 = arith.constant 0 : i32
    %c0_i32_0 = arith.constant 0 : i32
    return %arg1, %c0_i32 : i32, i32
  }
  func.func @transform_3(%arg0: i32, %arg1: i32) -> (i32, i32) {
    %c0_i32 = arith.constant 0 : i32
    %c0_i32_0 = arith.constant 0 : i32
    return %arg1, %c0_i32 : i32, i32
  }
  func.func @transform_4(%arg0: i32, %arg1: i32) -> (i32, i32, i32) {
    %c0_i32 = arith.constant 0 : i32
    %c0_i32_0 = arith.constant 0 : i32
    return %arg0, %arg1, %c0_i32 : i32, i32, i32
  }
  func.func @transform_5(%arg0: i32, %arg1: i32) -> (i32, i32, i32) {
    %c0_i32 = arith.constant 0 : i32
    %c0_i32_0 = arith.constant 0 : i32
    return %arg0, %arg1, %c0_i32 : i32, i32, i32
  }
  func.func @transform_6(%arg0: i32, %arg1: i32) -> (i32, i32, i32) {
    %c0_i32 = arith.constant 0 : i32
    %c0_i32_0 = arith.constant 0 : i32
    return %arg0, %arg1, %c0_i32 : i32, i32, i32
  }
}

</mosaic_0001>

<bundles_post_ra>
// kernel: tpu_custom_call.1
= control target key start
LH: loop header
LB: loop body
LE: loop exit
PB: predicated region body
PF: predicated region fallthrough
CT: control target
= control target key end

     0   :  { %12 = vsyncpa [#allocation3], 0  ;;  %s1196_s0 = inlined_call_operand.vmem [shape: bf16[2,8,32], index: 0, kind: input, shape index: {}]   ;;  %s1197_s1 = inlined_call_operand.vmem [shape: bf16[32,24], index: 1, kind: input, shape index: {}]   ;;  %s1198_s2 = inlined_call_operand.vmem [shape: f32[8,4], index: 2, kind: input, shape index: {}]   ;;  %s1199_s3 = inlined_call_operand.vmem [shape: f32[8,4], index: 3, kind: input, shape index: {}]   ;;  %s1200_s4 = inlined_call_operand.hbm [shape: bf16[2,8,8], index: 4, kind: output, shape index: {0}]   ;;  %s1201_s5 = inlined_call_operand.hbm [shape: bf16[2,8,8], index: 5, kind: output, shape index: {1}]   ;;  %s1202_s6 = inlined_call_operand.hbm [shape: bf16[2,8,8], index: 6, kind: output, shape index: {2}]  }
   0x1   :  { %14 = vsyncpa [#allocation3 + $0x1], 0 }
   0x2   :  { %15 = vsyncpa [#allocation5], 0 }
   0x3   :  { %17 = vsyncpa [#allocation5 + $0x1], 0  ;;  %s982_s21 = smov 0   ;;  %s984_s22 = smov 0  }
   0x4   :  { %s986_s23 = smov 0   ;;  %s988_s24 = smov 0  }
   0x5   :  { %s990_s25 = smov 0   ;;  %s992_s26 = smov 0  }
   0x6 LB: > { %s681_s27 = sadd.s32 4294967295, %s934_s26   ;;  %s1203_s28 = sadd.s32 4294967294, %s934_s26   ;;  %s934_s26 = sphi %s992_s26, %s23_s26   ;;  %s930_s25 = sphi %s990_s25, %s1211_s25   ;;  %s926_s24 = sphi %s988_s24, %s1210_s24   ;;  %s922_s23 = sphi %s986_s23, %s1209_s23   ;;  %s918_s22 = sphi %s984_s22, %s1208_s22   ;;  %s914_s21 = sphi %s982_s21, %s1207_s21  }
   0x7   : > { %s35_s29 = sadd.s32 1, %s930_s25  ;;  %s145_s30 = sadd.s32 1, %s922_s23 }
   0x8   : > { %p37_p0 = scmp.ge.s32.totalorder %s35_s29, 2  ;;  %p155_p1 = scmp.ne.s32.totalorder %s922_s23, %s918_s22 }
   0x9   : > { %p156_p2 = scmp.eq.s32.totalorder %s681_s27, 1  ;;  %p161_p3 = scmp.ne.s32.totalorder %s918_s22, %s914_s21 }
   0xa   : > { %s1213_s29 = smov (%p37_p0, %s35_s29), 0  ;;  %p162_p5 = scmp.eq.s32.totalorder %s1203_s28, 1 }
   0xb   : > { %p1024_p4 = por %p156_p2, %p155_p1  ;;  %s140_s8 = ssub.s32 %s930_s25, %s1213_s29 }
   0xc   : > { %p687_p6 = scmp.ge.s32.totalorder %s934_s26, 1  ;;  %p143_p7 = scmp.eq.s32.totalorder %s140_s8, 0 }
   0xd   : > { %p1033_p8 = por %p162_p5, %p161_p3  ;;  %p263_p9 = scmp.lt.s32.totalorder %s934_s26, 3 }
   0xe   : > { %s1039_s10 = scalar_select %p143_p7, %s922_s23, %s145_s30  }
   0xf   : > { %p264_p10 = pnand %p687_p6, %p263_p9 }
  0x10   : > { %v794_v0 = vld [vmem:[%s1197_s1] sm:$0xff] (!%p264_p10)   ;;  %v936_v1 = vmov (!%p264_p10), 0.0   ;;  %v795_v2 = vld [vmem:[%s1197_s1 + $0x8] sm:$0xff] (!%p264_p10)   ;;  %vm937_vm0 = vmmov (!%p264_p10), 0   ;;  %p313_p11 = scmp.lt.s32.totalorder (!%p264_p10), %s926_s24, 1  ;;  %s938_s19 = smov (!%p264_p10), 12  }
  0x11   : > { %267 = sbr.rel (%p264_p10) target bundleno = 518 (0x206), region = 36  ;;  %708 = vmatprep.subr.bf16.mxu0 (!%p264_p10), %v936_v1  ;;  %712 = vmatprep.mubr.msk.bf16.mxu0 (!%p264_p10), %vm937_vm0, %v936_v1  ;;  %v391_v3 = vld [vmem:[%s1199_s3] sm:$0xff] (!%p264_p10)  ;;  %s939_s30 = smov (!%p264_p10), 8   ;;  %vm346_vm1 = vcmask (!%p264_p10), 261120   ;;  %vm414_vm2 = vcmask (!%p264_p10), 31744   ;;  %vm417_vm3 = vcmask (!%p264_p10), 60416  }
  0x12   : > { %709 = vmatpush3.bf16.msra.mxu0 (!%p264_p10), %v794_v0  ;;  %v390_v4 = vld [vmem:[%s1198_s2] sm:$0xff] (!%p264_p10)  ;;  %423 = vrot.lane.b32.xlu0 (!%p264_p10), %v391_v3, %s938_s19  ;;  %s940_s14 = smov (!%p264_p10), 4   ;;  %s941_s15 = smov (!%p264_p10), 124  }
  0x13   : > { %710 = vmatprep.subr.bf16.mxu0 (!%p264_p10), %v936_v1  ;;  %419 = vrot.lane.b32.xlu1 (!%p264_p10), %v390_v4, %s939_s30  ;;  %s942_s16 = smov (!%p264_p10), 112   ;;  %s296_s17 = sand.u32 (!%p264_p10), 1, %s918_s22  }
  0x14   : > { %s943_s18 = smov (!%p264_p10), 120  }
  0x16   : > { %711 = vmatpush3.bf16.msra.mxu0 (!%p264_p10), %v795_v2  ;;  %436 = vrot.lane.b32.xlu0 (!%p264_p10), %v391_v3, %s939_s30 }
  0x17   : > { %432 = vrot.lane.b32.xlu1 (!%p264_p10), %v390_v4, %s938_s19  ;;  %s1059_s19 = sshll.u32 (!%p264_p10), %s296_s17, 2 }
  0x18   : > { %s314_s20 = scalar_select %p313_p11, %s926_s24, 1 }
  0x19   : > { %s298_s30 = scalar_lea.vmem [#allocation2], %s1059_s19 }
  0x1a   : > { %s691_s8 = sshll.u32 %s314_s20, 2  ;;  %394 = vrot.lane.b32.xlu0 %v391_v3, %s940_s14  ;;  %s1062_s20 = sshll.u32 %s926_s24, 6 }
  0x1b   : > { %s319_s13 = scalar_lea.vmem %s1196_s0, %s691_s8  ;;  %s489_s8 = sshll.u32 %s298_s30, 4  ;;  %s1072_s8 = int_to_ptr.vmem [resolvable:$true] %s489_s8 }
  0x1c   : > { %v329_v5 = vld [vmem:[%s319_s13] sm:$0xf]  ;;  %s1070_s13 = scalar_lea.hbm %s1200_s4, %s1062_s20  ;;  %s312_s24 = scalar_lea.vmem [#allocation6], %s1059_s19 }
  0x1d   : > { %713 = vmatmul.mubr.msk.bf16.vlgmr.msra.gmra.mrb[0].mxu0 %vm346_vm1, %v329_v5 }
  0x84   : > { %v424_v6 = vpop.permute.xlu0 %423 }
  0x85   : > { %v420_v18 = vpop.permute.xlu1 %419 }
  0x88   : > { %v437_v7 = vpop.permute.xlu0 %436 }
  0x89   : > { %v433_v19 = vpop.permute.xlu1 %432 }
  0x8c   : > { %v395_v12 = vpop.permute.xlu0 %394 }
  0xf0   : > { %v384_v8 = vpop.f32.mrb[0].mxu0 }
  0xf1   : > { %v714_v9 = vpop.f32.mrb[1].mxu0  ;;  %v439_v10 = vmul.f32 %v437_v7, %v384_v8  ;;  %v426_v11 = vmul.f32 %v424_v6, %v384_v8  ;;  %v397_v15 = vmul.f32 %v395_v12, %v384_v8  ;;  %v408_v16 = vmul.f32 %v391_v3, %v384_v8 }
  0xf2   : > { %v387_v13 = vpop.f32.mrb[2].mxu0  ;;  %v704_v17 = vpack.c.bf16 %v384_v8, %v384_v8  ;;  %v435_v20 = vmul.f32 %v433_v19, %v384_v8  ;;  %v422_v21 = vmul.f32 %v420_v18, %v384_v8  ;;  %v392_v30 = vmul.f32 %v390_v4, %v384_v8 }
  0xf3   : > { %441 = vrot.lane.b32.xlu0 %v439_v10, %s940_s14  ;;  %428 = vrot.lane.b32.xlu1 %v426_v11, %s941_s15  ;;  %v715_v14 = vpop.f32.mrb[3].mxu0 }
  0xf7   : > { %404 = vrot.lane.b32.xlu1 %v390_v4, %s940_s14  ;;  %399 = vrot.lane.b32.xlu0 %v397_v15, %s941_s15  ;;  %s796_s15 = scalar_lea.vmem %s1072_s8, 64 }
  0xf8   : > { %p797_p12 = scmp.ne.s32.totalorder %s1072_s8, %s796_s15 }
  0xfa   : > { %p798_p13 = pnand %p797_p12, %p1024_p4 }
  0xfb   : > { %410 = vrot.lane.b32.xlu1 %v408_v16, %s940_s14  ;;  %s465_s14 = scalar_lea.sflag [#allocation3], %s296_s17 }
  0xfc   : > { %p799_p0 = pneg %p798_p13 }
  0xff   : > { %460 = vrot.lane.b32.xlu1 %v704_v17, %s942_s16  ;;  %s944_s16 = smov [#allocation2]  }
 0x165   : > { %v442_v22 = vpop.permute.xlu0 %441  ;;  %v429_v23 = vpop.permute.xlu1 %428 }
 0x166   : > { %v444_v24 = vsub.f32 %v435_v20, %v442_v22  ;;  %v431_v25 = vadd.f32 %v429_v23, %v422_v21 }
 0x168   : > { %v789_v26 = vpack.i.bf16 %v444_v24, %v431_v25 }
 0x169   : > { %v405_v27 = vpop.permute.xlu1 %404  ;;  %v400_v28 = vpop.permute.xlu0 %399 }
 0x16a   : > { %790 = vrot.lane.b32.xlu0 %v789_v26, %s943_s18  ;;  %v407_v29 = vmul.f32 %v405_v27, %v384_v8  ;;  %v402_v32 = vadd.f32 %v400_v28, %v392_v30  ;;  %s800_s18 = sshll.u32 %s944_s16, 4  ;;  %s801_s18 = int_to_ptr.vmem [resolvable:$false] %s800_s18 }
 0x16b   : > { %s802_s11 = scalar_lea.vmem %s801_s18, 128  ;;  %p803_p1 = scmp.lt.s32.totalorder %s1072_s8, %s801_s18 }
 0x16c   : > { %p804_p2 = scmp.lt.s32.totalorder %s802_s11, %s796_s15 }
 0x16d   : > { %v411_v31 = vpop.permute.xlu1 %410 }
 0x16e   : > { %v413_v33 = vsub.f32 %v407_v29, %v411_v31  ;;  %p805_p3 = por %p804_p2, %p803_p1 }
 0x170   : > { %v415_v34 = vsel %vm414_vm2, %v402_v32, %v413_v33  ;;  %p806_p5 = pnand %p805_p3, %p799_p0 }
 0x171   : > { %v416_v35 = vpack.c.bf16 %v415_v34, %v415_v34  ;;  %v461_v36 = vpop.permute.xlu1 %460 }
 0x172   : > { %463 = vst.msk [vmem:[%s312_s24] sm:$0xf] %vm417_vm3, %v461_v36 }
 0x173   : > { %418 = vst.msk [vmem:[%s298_s30] sm:$0xf] %vm417_vm3, %v416_v35 }
 0x174   : > { %809 = shalt.err (!%p806_p5)
}
 0x175   : > { %s810_s17 = scalar_lea.hbm %s1070_s13, 64  ;;  %s814_s16 = scalar_lea.hbm %s1200_s4, 128 }
 0x176   : > { %p811_p6 = scmp.ne.s32.totalorder %s1070_s13, %s810_s17  ;;  %p815_p10 = scmp.lt.u32.totalorder %s1070_s13, %s1200_s4 }
 0x177   : > { %p816_p11 = scmp.lt.u32.totalorder %s814_s16, %s810_s17  ;;  %p818_p13 = scmp.lt.u32.totalorder %s810_s17, %s1070_s13 }
 0x178   : > { %p812_p7 = pnand %p811_p6, %p1024_p4 }
 0x179   : > { %p817_p12 = por %p816_p11, %p815_p10 }
 0x17a   : > { %p813_p9 = pneg %p812_p7 }
 0x17b   : > { %p819_p0 = por %p818_p13, %p817_p12 }
 0x17d   : > { %p820_p1 = pnand %p819_p0, %p813_p9 }
 0x17f   : > { %823 = shalt.err (!%p820_p1)
}
 0x180   : > { %716 = dma.vmem_to_hbm [thread:$0]  (%p1024_p4), %s1072_s8, 64, %s1070_s13, %s465_s14  }
 0x181   : > { %s1102_s28 = sand.u32 1, %s681_s27   ;;  %s305_s15 = scalar_lea.vmem [#allocation4], %s1059_s19 }
 0x182   : > { %s503_s11 = sshll.u32 %s305_s15, 4  ;;  %s517_s17 = sshll.u32 %s312_s24, 4  ;;  %s1114_s11 = int_to_ptr.vmem [resolvable:$true] %s503_s11  ;;  %s1116_s17 = int_to_ptr.vmem [resolvable:$true] %s517_s17 }
 0x183   : > { %s1112_s16 = scalar_lea.hbm %s1201_s5, %s1062_s20  ;;  %s1122_s19 = scalar_lea.hbm %s1202_s6, %s1062_s20 }
 0x184   : > { %s470_s13 = scalar_lea.sflag [#allocation5], %s1102_s28  ;;  %s824_s24 = scalar_lea.vmem %s1114_s11, 64 }
 0x185   : > { %p825_p2 = scmp.ne.s32.totalorder %s1114_s11, %s824_s24  ;;  %s945_s14 = smov [#allocation4]  }
 0x186   : > { %s828_s18 = sshll.u32 %s945_s14, 4  ;;  %s829_s18 = int_to_ptr.vmem [resolvable:$false] %s828_s18 }
 0x187   : > { %p826_p3 = pnand %p825_p2, %p1024_p4  ;;  %s830_s30 = scalar_lea.vmem %s829_s18, 128 }
 0x188   : > { %p831_p6 = scmp.lt.s32.totalorder %s1114_s11, %s829_s18  ;;  %p832_p7 = scmp.lt.s32.totalorder %s830_s30, %s824_s24 }
 0x189   : > { %p827_p5 = pneg %p826_p3 }
 0x18a   : > { %p833_p9 = por %p832_p7, %p831_p6 }
 0x18c   : > { %p834_p10 = pnand %p833_p9, %p827_p5 }
 0x1dc   : > { %v791_v37 = vpop.permute.xlu0 %790 }
 0x1dd   : > { %v793_v38 = vunpack.i.h.bf16 %v791_v37  ;;  %v792_v39 = vunpack.i.l.bf16 %v791_v37 }
 0x1df   : > { %v453_v40 = vsel %vm414_vm2, %v792_v39, %v793_v38 }
 0x1e0   : > { %v454_v41 = vpack.c.bf16 %v453_v40, %v453_v40 }
 0x1e2   : > { %455 = vst.msk [vmem:[%s305_s15] sm:$0xf] %vm417_vm3, %v454_v41 }
 0x1e3   : > { %837 = shalt.err (!%p834_p10)
}
 0x1e4   : > { %s838_s20 = scalar_lea.hbm %s1112_s16, 64  ;;  %s842_s27 = scalar_lea.hbm %s1201_s5, 128 }
 0x1e5   : > { %p839_p11 = scmp.ne.s32.totalorder %s1112_s16, %s838_s20  ;;  %p843_p0 = scmp.lt.u32.totalorder %s1112_s16, %s1201_s5 }
 0x1e6   : > { %p844_p1 = scmp.lt.u32.totalorder %s842_s27, %s838_s20  ;;  %p846_p3 = scmp.lt.u32.totalorder %s838_s20, %s1112_s16 }
 0x1e7   : > { %p840_p12 = pnand %p839_p11, %p1024_p4 }
 0x1e8   : > { %p845_p2 = por %p844_p1, %p843_p0 }
 0x1e9   : > { %p841_p13 = pneg %p840_p12 }
 0x1ea   : > { %p847_p5 = por %p846_p3, %p845_p2 }
 0x1ec   : > { %p848_p6 = pnand %p847_p5, %p841_p13 }
 0x1ee   : > { %851 = shalt.err (!%p848_p6)
}
 0x1ef   : > { %717 = dma.vmem_to_hbm [thread:$0]  (%p1024_p4), %s1114_s11, 64, %s1112_s16, %s470_s13  }
 0x1f0   : > { %s852_s24 = scalar_lea.vmem %s1116_s17, 64  ;;  %s946_s18 = smov [#allocation6]  }
 0x1f1   : > { %p853_p7 = scmp.ne.s32.totalorder %s1116_s17, %s852_s24  ;;  %s856_s30 = sshll.u32 %s946_s18, 4  ;;  %s857_s30 = int_to_ptr.vmem [resolvable:$false] %s856_s30 }
 0x1f2   : > { %s858_s20 = scalar_lea.vmem %s857_s30, 128  ;;  %p859_p11 = scmp.lt.s32.totalorder %s1116_s17, %s857_s30 }
 0x1f3   : > { %p854_p9 = pnand %p853_p7, %p1024_p4  ;;  %p860_p12 = scmp.lt.s32.totalorder %s858_s20, %s852_s24 }
 0x1f5   : > { %p855_p10 = pneg %p854_p9  ;;  %p861_p13 = por %p860_p12, %p859_p11 }
 0x1f7   : > { %p862_p0 = pnand %p861_p13, %p855_p10 }
 0x1f9   : > { %865 = shalt.err (!%p862_p0)
}
 0x1fa   : > { %s866_s11 = scalar_lea.hbm %s1122_s19, 64  ;;  %s870_s12 = scalar_lea.hbm %s1202_s6, 128 }
 0x1fb   : > { %p867_p1 = scmp.ne.s32.totalorder %s1122_s19, %s866_s11  ;;  %p871_p5 = scmp.lt.u32.totalorder %s1122_s19, %s1202_s6 }
 0x1fc   : > { %p872_p6 = scmp.lt.u32.totalorder %s870_s12, %s866_s11  ;;  %p874_p9 = scmp.lt.u32.totalorder %s866_s11, %s1122_s19 }
 0x1fd   : > { %p868_p2 = pnand %p867_p1, %p1024_p4 }
 0x1fe   : > { %p873_p7 = por %p872_p6, %p871_p5 }
 0x1ff   : > { %p869_p3 = pneg %p868_p2 }
 0x200   : > { %p875_p10 = por %p874_p9, %p873_p7 }
 0x202   : > { %p876_p11 = pnand %p875_p10, %p869_p3 }
 0x204   : > { %879 = shalt.err (!%p876_p11)
}
 0x205   : > { %718 = dma.vmem_to_hbm [thread:$0]  (%p1024_p4), %s1116_s17, 64, %s1122_s19, %s470_s13  }
 0x206 PF: > { %p732_p12 = scmp.ge.s32.totalorder %s934_s26, 2  ;;  %s529_s14 = sand.u32 1, %s914_s21  }
 0x207   : > { %s530_s24 = scalar_lea.sflag [#allocation3], %s529_s14 }
 0x208   : > { %p723_p13 = pnand %p732_p12, %p1033_p8 }
 0x20a   : > { %905 = dma.done.wait (!%p723_p13), %s530_s24, 64  }
 0x20b   : > { %907 = vsyncadd (!%p723_p13), %s530_s24, 4294967232  ;;  %s1206_s18 = sadd.s32 4294967294, %s934_s26  }
 0x20c   : > { %s538_s30 = sand.u32 1, %s1206_s18  }
 0x20d   : > { %s539_s7 = scalar_lea.sflag [#allocation5], %s538_s30 }
 0x20e   : > { %909 = dma.done.wait (!%p723_p13), %s539_s7, 128  }
 0x20f   : > { %911 = vsyncadd (!%p723_p13), %s539_s7, 4294967168  ;;  %s23_s26 = sadd.s32 1, %s934_s26   ;;  %s1207_s21 = smov %s918_s22 }
 0x210   : > { %p20_p4 = scmp.ge.s32.totalorder %s23_s26, 4   ;;  %s1208_s22 = smov %s922_s23 }
 0x211   : > { %s1209_s23 = smov %s1039_s10  ;;  %s1210_s24 = smov %s930_s25 }
 0x212   : > { %s1211_s25 = smov %s1213_s29  ;;  %22 = sbr.rel (!%p20_p4) target bundleno = 6 (0x6), region = 109 }
 0x219   :  { %553 = vsyncpa [#allocation3], 1 }
 0x21a   :  { %555 = vsyncpa [#allocation3 + $0x1], 1 }
 0x21b   :  { %556 = vsyncpa [#allocation5], 1 }
 0x21c   :  { %558 = vsyncpa [#allocation5 + $0x1], 1 }

</bundles_post_ra>
